<compile_context>
chip_gen: v5e
topology: v5e:2x2
jax: 0.10.0
libtpu: 0.0.40
codegen_flags: <defaults>
</compile_context>

<pallas_src>
import functools

import jax
import jax.numpy as jnp
from jax.experimental import pallas as pl
from jax.experimental.pallas import tpu as pltpu


# ----------------------------------------------------------------------------
# Tiling helper: largest row tile that (a) divides the row count, (b) is a
# multiple of 8, (c) keeps the per-buffer footprint <= ~4 MiB, and (d) leaves
# at least 2 grid steps so both v7x TensorCores get work.
# ----------------------------------------------------------------------------
def _pick_row_tile(rows: int, d: int, itemsize: int, *,
                   target_rows: int = 512, max_tile_bytes: int = 4 << 20) -> int:
    if rows % 8 != 0:
        return rows  # full-extent block is always legal
    cap = max(8, max_tile_bytes // max(1, d * itemsize))
    target = min(target_rows, cap, max(8, rows // 2))
    for cand in (1024, 512, 256, 128, 64, 32, 16, 8):
        if cand <= target and rows % cand == 0:
            return cand
    return rows


# ----------------------------------------------------------------------------
# Kernel 1: pre-norm LayerNormalization (scalar alpha / bias, unbiased std,
# eps added to std — matches the PyTorch reference exactly).
# ----------------------------------------------------------------------------
def _prenorm_kernel(alpha_ref, bias_ref, x_ref, o_ref, *, eps: float, d: int):
    x = x_ref[...].astype(jnp.float32)                      # (TS, D)
    alpha = alpha_ref[0]                                    # SMEM scalars, read once
    bias = bias_ref[0]

    mean = jnp.mean(x, axis=-1, keepdims=True)              # (TS, 1)
    diff = x - mean
    # torch.std default is the unbiased estimator (divide by N-1).
    var = jnp.sum(diff * diff, axis=-1, keepdims=True) * (1.0 / (d - 1))
    std = jnp.sqrt(var)

    # Hoisted: one reciprocal per row (not one divide per element); alpha
    # folded into the per-row scale. approx=False keeps exact numerics.
    inv = pl.reciprocal(std + jnp.float32(eps), approx=False)   # (TS, 1)
    scale = alpha * inv

    o_ref[...] = (diff * scale + bias).astype(o_ref.dtype)


def layer_norm(x, alpha, bias, *, eps: float = 1e-6):
    orig_shape = x.shape
    d = int(orig_shape[-1])
    if d < 2:
        raise ValueError("LayerNormalization needs d_model >= 2 (unbiased std).")
    x2 = x.reshape(-1, d)
    rows = x2.shape[0]
    ts = _pick_row_tile(rows, d, jnp.dtype(x.dtype).itemsize)
    grid = (rows // ts,)
    block = pl.BlockSpec((ts, d), lambda i: (i, 0))

    out = pl.pallas_call(
        functools.partial(_prenorm_kernel, eps=float(eps), d=d),
        out_shape=jax.ShapeDtypeStruct((rows, d), x.dtype),
        grid=grid,
        in_specs=[
            pl.BlockSpec(memory_space=pltpu.MemorySpace.SMEM),  # alpha (1,)
            pl.BlockSpec(memory_space=pltpu.MemorySpace.SMEM),  # bias  (1,)
            block,
        ],
        out_specs=block,
        compiler_params=pltpu.CompilerParams(
            dimension_semantics=("parallel",),
        ),
    )(alpha, bias, x2)
    return out.reshape(orig_shape)


# ----------------------------------------------------------------------------
# Kernel 2: fused residual add (eval mode: dropout is identity).
# ----------------------------------------------------------------------------
def _residual_add_kernel(x_ref, y_ref, o_ref):
    o_ref[...] = x_ref[...] + y_ref[...]


# Training-mode variant: fused dropout mask (on-chip PRNG) + residual add.
def _residual_dropout_add_kernel(seed_ref, x_ref, y_ref, o_ref, *, rate: float):
    pltpu.prng_seed(seed_ref[0] + pl.program_id(0))
    bits = pltpu.bitcast(pltpu.prng_random_bits(y_ref.shape), jnp.uint32)
    thresh = jnp.uint32(min(int(rate * float(2 ** 32)), 2 ** 32 - 1))
    keep = bits >= thresh                                   # P(keep) = 1 - rate
    y = y_ref[...].astype(jnp.float32)
    kept = jnp.where(keep, y * jnp.float32(1.0 / (1.0 - rate)), jnp.float32(0.0))
    o_ref[...] = (x_ref[...].astype(jnp.float32) + kept).astype(o_ref.dtype)


def residual_add(x, y, *, dropout_rate: float = 0.0, training: bool = False, seed: int = 0):
    orig_shape = x.shape
    d = int(orig_shape[-1])
    x2 = x.reshape(-1, d)
    y2 = y.reshape(-1, d)
    rows = x2.shape[0]
    ts = _pick_row_tile(rows, d, jnp.dtype(x.dtype).itemsize)
    grid = (rows // ts,)
    block = pl.BlockSpec((ts, d), lambda i: (i, 0))
    # TODO(synk): add input_output_aliases={0: 0} (alias x -> out) when the
    # caller no longer needs x after this call; it is kept off here for safety.

    if training and dropout_rate > 0.0:
        seed_arr = jnp.asarray([seed], dtype=jnp.int32)
        out = pl.pallas_call(
            functools.partial(_residual_dropout_add_kernel, rate=float(dropout_rate)),
            out_shape=jax.ShapeDtypeStruct((rows, d), x.dtype),
            grid=grid,
            in_specs=[
                pl.BlockSpec(memory_space=pltpu.MemorySpace.SMEM),  # seed (1,)
                block,
                block,
            ],
            out_specs=block,
            compiler_params=pltpu.CompilerParams(
                dimension_semantics=("arbitrary",),
            ),
        )(seed_arr, x2, y2)
    else:
        out = pl.pallas_call(
            _residual_add_kernel,
            out_shape=jax.ShapeDtypeStruct((rows, d), x.dtype),
            grid=grid,
            in_specs=[block, block],
            out_specs=block,
            compiler_params=pltpu.CompilerParams(
                dimension_semantics=("parallel",),
            ),
        )(x2, y2)
    return out.reshape(orig_shape)


# ----------------------------------------------------------------------------
# ResidualConnection.forward
# ----------------------------------------------------------------------------
def residual_connection_forward(x, sublayer, alpha, bias, *, eps: float = 1e-6,
                                dropout_rate: float = 0.0, training: bool = False,
                                seed: int = 0):
    normed = layer_norm(x, alpha, bias, eps=eps)
    # TODO(synk): `sublayer` is an arbitrary callable (attention / FFN block);
    # it cannot be fused into the Pallas kernels in general, so it runs as
    # plain JAX between the two fused kernels.
    y = sublayer(normed)
    return residual_add(x, y, dropout_rate=dropout_rate, training=training, seed=seed)


# ----------------------------------------------------------------------------
# Pure-JAX reference (eval mode: dropout is identity).
# ----------------------------------------------------------------------------
def _reference(x, sublayer, alpha, bias, eps=1e-6):
    x32 = x.astype(jnp.float32)
    mean = jnp.mean(x32, axis=-1, keepdims=True)
    std = jnp.std(x32, axis=-1, keepdims=True, ddof=1)
    normed = (alpha[0] * (x32 - mean) / (std + eps) + bias[0]).astype(x.dtype)
    return x + sublayer(normed)


if __name__ == "__main__":
    key = jax.random.PRNGKey(0)
    kx, kw = jax.random.split(key)

    # Small transformer-like shapes; d_model = 128 keeps stores lane-dense.
    B, S, D = 2, 8, 128
    x = jax.random.normal(kx, (B, S, D), dtype=jnp.float32)
    w = (jax.random.normal(kw, (D, D), dtype=jnp.float32) / jnp.sqrt(D)).astype(jnp.float32)

    def sublayer(z):
        return jnp.tanh(jnp.dot(z, w, precision=jax.lax.Precision.HIGHEST))

    # Parameter init matching LayerNormalization.__init__: alpha=ones(1), bias=zeros(1).
    alpha = jnp.ones((1,), dtype=jnp.float32)
    bias = jnp.zeros((1,), dtype=jnp.float32)

    out = residual_connection_forward(
        x, sublayer, alpha, bias, eps=1e-6,
        dropout_rate=0.1, training=False,   # eval mode: dropout is identity
    )
    out = jax.block_until_ready(out)

    ref = _reference(x, sublayer, alpha, bias, eps=1e-6)
    assert out.shape == x.shape
    assert jnp.allclose(out, ref, atol=1e-5, rtol=1e-5), float(jnp.max(jnp.abs(out - ref)))

    print("KERNEL_OK")
</pallas_src>

<mosaic_0001>
module attributes {stable_mosaic.version = 11 : i64} {
  func.func @_prenorm_kernel(%arg0: i32, %arg1: memref<1xf32, #tpu.memory_space<smem>>, %arg2: memref<1xf32, #tpu.memory_space<smem>>, %arg3: memref<8x128xf32, #tpu.memory_space<vmem>>, %arg4: memref<8x128xf32, #tpu.memory_space<vmem>>) attributes {dimension_semantics = [#tpu.dimension_semantics<parallel>], iteration_bounds = array<i64: 2>, scalar_prefetch = 0 : i64, scratch_operands = 0 : i64, tpu.core_type = #tpu.core_type<tc>, window_params = [{transform_indices = @transform_0, window_bounds = array<i64: 1>}, {transform_indices = @transform_1, window_bounds = array<i64: 1>}, {transform_indices = @transform_2, window_bounds = array<i64: 8, 128>}, {transform_indices = @transform_3, window_bounds = array<i64: 8, 128>}]} {
    %c0 = arith.constant 0 : index
    %c0_0 = arith.constant 0 : index
    %0 = vector.load %arg3[%c0, %c0_0] : memref<8x128xf32, #tpu.memory_space<vmem>>, vector<8x128xf32>
    %c0_1 = arith.constant 0 : index
    %1 = memref.load %arg1[%c0_1] : memref<1xf32, #tpu.memory_space<smem>>
    %c0_2 = arith.constant 0 : index
    %2 = memref.load %arg2[%c0_2] : memref<1xf32, #tpu.memory_space<smem>>
    %cst = arith.constant dense<0.000000e+00> : vector<8xf32>
    %3 = vector.multi_reduction <add>, %0, %cst [1] : vector<8x128xf32> to vector<8xf32>
    %4 = vector.shape_cast %3 : vector<8xf32> to vector<8x1xf32>
    %cst_3 = arith.constant 1.280000e+02 : f32
    %5 = vector.broadcast %cst_3 : f32 to vector<8x1xf32>
    %6 = arith.divf %4, %5 : vector<8x1xf32>
    %7 = vector.broadcast %6 : vector<8x1xf32> to vector<8x128xf32>
    %8 = arith.subf %0, %7 : vector<8x128xf32>
    %9 = arith.mulf %8, %8 : vector<8x128xf32>
    %cst_4 = arith.constant dense<0.000000e+00> : vector<8xf32>
    %10 = vector.multi_reduction <add>, %9, %cst_4 [1] : vector<8x128xf32> to vector<8xf32>
    %11 = vector.shape_cast %10 : vector<8xf32> to vector<8x1xf32>
    %cst_5 = arith.constant 0.00787401571 : f32
    %12 = vector.broadcast %cst_5 : f32 to vector<8x1xf32>
    %13 = arith.mulf %11, %12 : vector<8x1xf32>
    %14 = math.sqrt %13 : vector<8x1xf32>
    %cst_6 = arith.constant 9.99999997E-7 : f32
    %15 = vector.broadcast %cst_6 : f32 to vector<8x1xf32>
    %16 = arith.addf %14, %15 : vector<8x1xf32>
    %17 = tpu.reciprocal %16 : vector<8x1xf32> -> vector<8x1xf32>
    %18 = vector.broadcast %1 : f32 to vector<8x1xf32>
    %19 = arith.mulf %18, %17 : vector<8x1xf32>
    %20 = vector.broadcast %19 : vector<8x1xf32> to vector<8x128xf32>
    %21 = arith.mulf %8, %20 : vector<8x128xf32>
    %22 = vector.broadcast %2 : f32 to vector<8x128xf32>
    %23 = arith.addf %21, %22 : vector<8x128xf32>
    %c0_7 = arith.constant 0 : index
    %c0_8 = arith.constant 0 : index
    %24 = vector.load %arg4[%c0_7, %c0_8] : memref<8x128xf32, #tpu.memory_space<vmem>>, vector<8x128xf32>
    tpu.vector_store %arg4[%c0_7, %c0_8], %23 {strides = array<i32>} : memref<8x128xf32, #tpu.memory_space<vmem>>, vector<8x128xf32>,
    return
  }
  func.func @transform_0(%arg0: i32) -> i32 {
    %c0_i32 = arith.constant 0 : i32
    %c0_i32_0 = arith.constant 0 : i32
    return %c0_i32 : i32
  }
  func.func @transform_1(%arg0: i32) -> i32 {
    %c0_i32 = arith.constant 0 : i32
    %c0_i32_0 = arith.constant 0 : i32
    return %c0_i32 : i32
  }
  func.func @transform_2(%arg0: i32) -> (i32, i32) {
    %c0_i32 = arith.constant 0 : i32
    %c0_i32_0 = arith.constant 0 : i32
    return %arg0, %c0_i32 : i32, i32
  }
  func.func @transform_3(%arg0: i32) -> (i32, i32) {
    %c0_i32 = arith.constant 0 : i32
    %c0_i32_0 = arith.constant 0 : i32
    return %arg0, %c0_i32 : i32, i32
  }
}

</mosaic_0001>

<bundles_post_ra>
// kernel: tpu_custom_call.1
= control target key start
LH: loop header
LB: loop body
LE: loop exit
PB: predicated region body
PF: predicated region fallthrough
CT: control target
= control target key end

     0   :  { %s648_s0 = inlined_call_operand.<no memory space> [shape: f32[1], index: 0, kind: input, shape index: {}]   ;;  %s649_s1 = inlined_call_operand.<no memory space> [shape: f32[1], index: 1, kind: input, shape index: {}]   ;;  %s650_s2 = inlined_call_operand.hbm [shape: f32[16,128], index: 2, kind: input, shape index: {}]   ;;  %s651_s3 = inlined_call_operand.hbm [shape: f32[16,128], index: 3, kind: output, shape index: {}]  }
   0x1   :  { %8 = sst [smem:[#allocation2]] %s648_s0 }
   0x2   :  { %9 = sst [smem:[#allocation3]] %s649_s1 }
   0x3   :  { %10 = vsyncpa [#allocation5], 0 }
   0x4   :  { %12 = vsyncpa [#allocation5 + $0x1], 0 }
   0x5   :  { %13 = vsyncpa [#allocation6], 0 }
   0x6   :  { %15 = vsyncpa [#allocation6 + $0x1], 0  ;;  %s517_s16 = smov 0   ;;  %s519_s17 = smov 0  }
   0x7   :  { %s521_s18 = smov 0   ;;  %s523_s19 = smov 0  }
   0x8 LB: > { %s538_s0 = sadd.s32 4294967295, %s488_s19   ;;  %s327_s1 = sadd.s32 4294967294, %s488_s19   ;;  %s488_s19 = sphi %s523_s19, %s661_s19   ;;  %s484_s18 = sphi %s521_s18, %s660_s18   ;;  %s480_s17 = sphi %s519_s17, %s659_s17   ;;  %s476_s16 = sphi %s517_s16, %s658_s16  }
   0x9   : > { %s542_s20 = sadd.s32 1, %s488_s19   ;;  %s70_s21 = sadd.s32 1, %s484_s18 }
   0xa   : > { %s67_s22 = ssub.s32 %s488_s19, %s542_s20  ;;  %p77_p0 = scmp.ne.s32.totalorder %s484_s18, %s480_s17 }
   0xb   : > { %p68_p1 = scmp.eq.s32.totalorder %s67_s22, 0  ;;  %p78_p2 = scmp.eq.s32.totalorder %s488_s19, 0 }
   0xc   : > { %p83_p3 = scmp.ne.s32.totalorder %s480_s17, %s476_s16  ;;  %p84_p4 = scmp.eq.s32.totalorder %s538_s0, 0 }
   0xd   : > { %s554_s23 = scalar_select %p68_p1, %s484_s18, %s70_s21  }
   0xe   : > { %p556_p5 = por %p78_p2, %p77_p0  ;;  %p560_p6 = por %p84_p4, %p83_p3 }
   0xf   : > { %p107_p7 = scmp.eq.s32.totalorder %s538_s0, 1  ;;  %p113_p8 = scmp.eq.s32.totalorder %s327_s1, 1 }
  0x10   : > { %p351_p10 = scmp.lt.s32.totalorder %s488_s19, 2  ;;  %s139_s28 = sand.u32 1, %s484_s18  }
  0x11   : > { %p567_p11 = por %p107_p7, %p77_p0  ;;  %p571_p12 = por %p113_p8, %p83_p3 }
  0x12   : > { %s331_s29 = sshll.u32 %s488_s19, 3  ;;  %s330_s30 = sshll.u32 %s139_s28, 3 }
  0x13   : > { %s147_s6 = scalar_lea.hbm %s650_s2, %s331_s29  ;;  %s143_s8 = scalar_lea.vmem [#allocation4], %s330_s30 }
  0x14   : > { %s149_s7 = sshll.u32 %s147_s6, 4  ;;  %s151_s9 = sshll.u32 %s143_s8, 4  ;;  %s150_s7 = int_to_ptr.hbm [resolvable:$true] %s149_s7  ;;  %s152_s9 = int_to_ptr.vmem [resolvable:$true] %s151_s9 }
  0x15   : > { %p582_p13 = pnand %p351_p10, %p556_p5  ;;  %p332_p0 = scmp.ge.s32.totalorder %s488_s19, 1 }
  0x16   : > { %p156_p1 = scmp.lt.s32.totalorder %s488_s19, 3  ;;  %s140_s11 = scalar_lea.sflag [#allocation5], %s139_s28 }
  0x17   : > { %s392_s12 = sshra.s32 %s150_s7, 4  ;;  %p396_p3 = pneg %p582_p13  ;;  %s393_s12 = int_to_ptr.hbm [resolvable:$true] %s392_s12 }
  0x18   : > { %s394_s13 = scalar_lea.hbm %s393_s12, 8  ;;  %s399_s1 = scalar_lea.hbm %s650_s2, 16 }
  0x19   : > { %p395_p2 = scmp.ne.s32.totalorder %s393_s12, %s394_s13  ;;  %p400_p5 = scmp.lt.s32.totalorder %s393_s12, %s650_s2 }
  0x1a   : > { %p401_p8 = scmp.lt.s32.totalorder %s399_s1, %s394_s13 }
  0x1b   : > { %p397_p4 = pnand %p396_p3, %p395_p2 }
  0x1c   : > { %p402_p10 = por %p401_p8, %p400_p5 }
  0x1d   : > { %p398_p7 = pneg %p397_p4 }
  0x1f   : > { %p403_p9 = pnand %p402_p10, %p398_p7 }
  0x21   : > { %406 = shalt.err (!%p403_p9)
}
  0x22   : > { %346 = dma.hbm_to_vmem [thread:$0]  (!%p582_p13), %s150_s7, 128, %s152_s9, %s140_s11  }
  0x23   : > { %p157_p2 = pnand %p332_p0, %p156_p1 }
  0x24   : > { %s603_s24 = sand.u32 (!%p157_p2), 1, %s480_s17  }
  0x25   : > { %160 = sbr.rel (%p157_p2) target bundleno = 333 (0x14d), region = 32  ;;  %s333_s28 = sshll.u32 (!%p157_p2), %s603_s24, 3 }
  0x26   : > { %s163_s29 = scalar_lea.sflag (!%p157_p2), [#allocation5], %s603_s24  ;;  %s166_s30 = scalar_lea.vmem (!%p157_p2), [#allocation4], %s333_s28 }
  0x2a   : > { %467 = dma.done.wait (%p560_p6), %s163_s29, 128  }
  0x2b   : > { %469 = vsyncadd (%p560_p6), %s163_s29, 4294967168  ;;  %v190_v0 = vld [vmem:[%s166_s30] sm:$0xff]  ;;  %v490_v1 = vmov 128.0   ;;  %s191_s25 = sld [smem:[#allocation2]]  ;;  %s336_s5 = sshll.u32 %s538_s0, 3 }
  0x2c   : > { %193 = vadd.xlane.f32.xlu0 %v190_v0  ;;  %386 = vrcp.f32 %v490_v1  ;;  %s192_s4 = sld [smem:[#allocation3]]  ;;  %s252_s8 = scalar_lea.hbm %s651_s3, %s336_s5 }
  0x2d   : > { %s189_s9 = scalar_lea.vmem [#allocation7], %s333_s28  ;;  %s256_s0 = sshll.u32 %s252_s8, 4  ;;  %s257_s0 = int_to_ptr.hbm [resolvable:$true] %s256_s0 }
  0x2e   : > { %s254_s10 = sshll.u32 %s189_s9, 4  ;;  %s242_s11 = scalar_lea.sflag [#allocation6], %s603_s24  ;;  %s255_s10 = int_to_ptr.vmem [resolvable:$true] %s254_s10 }
  0x2f   : > { %s436_s12 = sshra.s32 %s257_s0, 4  ;;  %s442_s1 = scalar_lea.hbm %s651_s3, 16  ;;  %s437_s12 = int_to_ptr.hbm [resolvable:$true] %s436_s12 }
  0x30   : > { %s438_s13 = scalar_lea.hbm %s437_s12, 8  ;;  %p443_p0 = scmp.lt.s32.totalorder %s437_s12, %s651_s3 }
  0x31   : > { %v235_v32 = vstv %s191_s25  ;;  %p439_p6 = scmp.ne.s32.totalorder %s437_s12, %s438_s13  ;;  %p444_p1 = scmp.lt.s32.totalorder %s442_s1, %s438_s13 }
  0x32   : > { %v387_v2 = vpop.eup %386  ;;  %v238_v37 = vstv %s192_s4 }
  0x33   : > { %v196_v3 = vmul.f32 128.0, %v387_v2  ;;  %vm200_vm0 = vweird.f32 %v387_v2  ;;  %p440_p9 = pnand %p439_p6, %p567_p11  ;;  %p445_p3 = por %p444_p1, %p443_p0 }
  0x35   : > { %v197_v4 = vsub.f32 1.0, %v196_v3  ;;  %p441_p13 = pneg %p440_p9 }
  0x37   : > { %v198_v5 = vmul.f32 %v387_v2, %v197_v4  ;;  %p446_p4 = pnand %p445_p3, %p441_p13 }
  0x39   : > { %v199_v6 = vadd.f32 %v387_v2, %v198_v5 }
  0x3b   : > { %v201_v7 = vsel %vm200_vm0, %v387_v2, %v199_v6 }
  0x9f   : > { %v194_v8 = vpop.xlane.xlu0 %193 }
  0xa0   : > { %v202_v9 = vmul.f32 %v201_v7, %v194_v8 }
  0xa2   : > { %v203_v10 = vsub.f32 %v190_v0, %v202_v9 }
  0xa4   : > { %v204_v11 = vmul.f32 %v203_v10, %v203_v10 }
  0xa6   : > { %205 = vadd.xlane.f32.xlu0 %v204_v11 }
 0x119   : > { %v206_v12 = vpop.xlane.xlu0 %205 }
 0x11a   : > { %v207_v13 = vmul.f32 0.007874016, %v206_v12 }
 0x11c   : > { %388 = vrsqrt.f32 %v207_v13  ;;  %vm215_vm1 = vcmp.eq.f32.partialorder %v207_v13, inf  ;;  %v218_v21 = vand.u32 2147483648, %v207_v13  ;;  %vm217_vm2 = vcmp.eq.f32.partialorder %v207_v13, 0.0 }
 0x122   : > { %v389_v14 = vpop.eup %388 }
 0x123   : > { %v209_v15 = vmul.f32 %v389_v14, %v207_v13 }
 0x125   : > { %v210_v16 = vmul.f32 %v389_v14, %v209_v15 }
 0x127   : > { %v211_v17 = vmul.f32 0.5, %v210_v16 }
 0x129   : > { %v212_v18 = vsub.f32 1.5, %v211_v17 }
 0x12b   : > { %v213_v19 = vmul.f32 %v389_v14, %v212_v18 }
 0x12d   : > { %v214_v20 = vmul.f32 %v213_v19, %v207_v13 }
 0x12f   : > { %v216_v22 = vsel %vm215_vm1, %v207_v13, %v214_v20 }
 0x130   : > { %v219_v23 = vsel %vm217_vm2, %v218_v21, %v216_v22 }
 0x131   : > { %v220_v24 = vadd.f32 1e-06, %v219_v23 }
 0x133   : > { %390 = vrcp.f32 %v220_v24  ;;  %v232_v28 = vand.u32 2147483648, %v220_v24  ;;  %v230_v30 = vand.u32 2147483647, %v220_v24  ;;  %vm226_vm4 = vweird.f32 %v220_v24 }
 0x135   : > { %v233_v33 = vor.u32 1.1754944e-38, %v232_v28  ;;  %vm231_vm6 = vcmp.eq.f32.partialorder %v230_v30, 8.507059e+37 }
 0x139   : > { %v391_v25 = vpop.eup %390 }
 0x13a   : > { %v222_v26 = vmul.f32 %v391_v25, %v220_v24  ;;  %vm227_vm3 = vweird.f32 %v391_v25 }
 0x13b   : > { %vm228_vm5 = vmor %vm226_vm4, %vm227_vm3 }
 0x13c   : > { %v223_v27 = vsub.f32 1.0, %v222_v26 }
 0x13e   : > { %v224_v29 = vmul.f32 %v391_v25, %v223_v27 }
 0x140   : > { %v225_v31 = vadd.f32 %v391_v25, %v224_v29 }
 0x142   : > { %v229_v34 = vsel %vm228_vm5, %v391_v25, %v225_v31 }
 0x143   : > { %v234_v35 = vsel %vm231_vm6, %v233_v33, %v229_v34 }
 0x144   : > { %v236_v36 = vmul.f32 %v235_v32, %v234_v35 }
 0x146   : > { %v237_v38 = vmul.f32 %v236_v36, %v203_v10 }
 0x148   : > { %v239_v39 = vadd.f32 %v238_v37, %v237_v38 }
 0x14a   : > { %240 = vst [vmem:[%s189_s9] sm:$0xff] %v239_v39 }
 0x14b   : > { %449 = shalt.err (!%p446_p4)
}
 0x14c   : > { %341 = dma.vmem_to_hbm [thread:$0]  (%p567_p11), %s255_s10, 128, %s257_s0, %s242_s11  }
 0x14d PF: > { %s268_s24 = sand.u32 1, %s476_s16   ;;  %p657_p7 = scmp.ge.s32.totalorder %s488_s19, 2 }
 0x14e   : > { %s269_s28 = scalar_lea.sflag [#allocation6], %s268_s24 }
 0x14f   : > { %p348_p5 = pnand %p657_p7, %p571_p12 }
 0x151   : > { %p349_p8 = pneg %p348_p5 }
 0x153   : > { %471 = dma.done.wait (%p349_p8), %s269_s28, 128  }
 0x154   : > { %473 = vsyncadd (%p349_p8), %s269_s28, 4294967168  ;;  %p18_p10 = scmp.ge.s32.totalorder %s542_s20, 4   ;;  %s658_s16 = smov %s480_s17 }
 0x155   : > { %s659_s17 = smov %s484_s18  ;;  %s660_s18 = smov %s554_s23 }
 0x156   : > { %s661_s19 = smov %s542_s20  ;;  %20 = sbr.rel (!%p18_p10) target bundleno = 8 (0x8), region = 77 }
 0x15b   :  { %275 = vsyncpa [#allocation5], 1 }
 0x15c   :  { %277 = vsyncpa [#allocation5 + $0x1], 1 }
 0x15d   :  { %278 = vsyncpa [#allocation6], 1 }
 0x15e   :  { %280 = vsyncpa [#allocation6 + $0x1], 1 }

</bundles_post_ra>
